<compile_context>
chip_gen: v6e
topology: v6e:2x2x1
jax: 0.10.0
libtpu: 0.0.40
codegen_flags: <defaults>
</compile_context>

<pallas_src>
import functools

import jax
import jax.numpy as jnp
from jax.experimental import pallas as pl
from jax.experimental.pallas import tpu as pltpu

D = 128            # per-modality feature dim
OUT = 128          # fusion output_size
NCLS = 5           # classifier classes
NCLS_PAD = 8       # padded classifier width (was 128 -> 16x less writeback)
EPS = 1e-5         # nn.LayerNorm default


def _fusion_classifier_kernel(img_ref, txt_ref, aud_ref,
                              w0_ref, w1_ref, w2_ref, b_ref,
                              wc_ref, bc_ref,
                              out_ref):
    """One batch tile: fused Linear + ReLU + LayerNorm + classifier Linear."""
    # ---- Linear(3*D -> OUT): three 128-wide dots accumulate (MXU bf16, f32 acc)
    h = jnp.dot(img_ref[...].astype(jnp.bfloat16), w0_ref[...],
                preferred_element_type=jnp.float32)
    h += jnp.dot(txt_ref[...].astype(jnp.bfloat16), w1_ref[...],
                 preferred_element_type=jnp.float32)
    h += jnp.dot(aud_ref[...].astype(jnp.bfloat16), w2_ref[...],
                 preferred_element_type=jnp.float32)
    h += b_ref[...]

    # ---- ReLU (VPU); Dropout -> identity at inference.
    h = jnp.maximum(h, 0.0)

    # ---- LayerNorm over last dim, two-pass (centered) stats in f32.
    #      gamma/beta are folded into the classifier weights (wrapper).
    mean = jnp.mean(h, axis=-1, keepdims=True)
    centered = h - mean
    var = jnp.mean(centered * centered, axis=-1, keepdims=True)
    normed = centered * jax.lax.rsqrt(var + EPS)

    # ---- classifier Linear(OUT -> NCLS_PAD): bf16 operands, f32 accumulation.
    logits = jnp.dot(normed.astype(jnp.bfloat16), wc_ref[...],
                     preferred_element_type=jnp.float32) + bc_ref[...]
    out_ref[...] = logits.astype(out_ref.dtype)


def _round_up(x, m):
    return (x + m - 1) // m * m


@functools.partial(jax.jit, static_argnames=("block_b",))
def multimodal_forward(img_feat, txt_feat, aud_feat, params, *, block_b=2048):
    """Fusion + classifier forward. Inputs: three [B, 128] modality embeddings
    (f32 or bf16; bf16 halves the dominant input HBM traffic)."""
    B = img_feat.shape[0]

    # --- batch tiling (no wrapper-side padding of the inputs) -------------
    if B >= 256:
        # >=2 grid steps so both v7x TensorCores get work; TB multiple of 128
        # keeps input loads and output stores tile-aligned.
        n_tiles = max(2, -(-B // block_b))
        TB = _round_up(-(-B // n_tiles), 128)
    else:
        # Tiny batch: one block equal to the full array (layout-legal via the
        # "block dim == full array dim" rule), no masking needed.
        TB = B
    grid = pl.cdiv(B, TB)

    # --- parameter prep (tiny, done once per call) -------------------------
    w0 = params["w_img"].astype(jnp.bfloat16)          # [D, OUT]
    w1 = params["w_txt"].astype(jnp.bfloat16)
    w2 = params["w_aud"].astype(jnp.bfloat16)
    b = params["b"].reshape(1, OUT).astype(jnp.float32)

    # Fold LayerNorm affine into the classifier:  wc' = gamma[:,None]*wc,
    # bc' = beta @ wc + bc   (mathematically identical, removes 2 VPU passes).
    gamma = params["gamma"].astype(jnp.float32)
    beta = params["beta"].astype(jnp.float32)
    wc_f32 = params["wc"].astype(jnp.float32)           # [OUT, NCLS]
    wc_eff = gamma[:, None] * wc_f32
    bc_eff = beta @ wc_f32 + params["bc"].astype(jnp.float32)
    wc = jnp.zeros((OUT, NCLS_PAD), jnp.bfloat16).at[:, :NCLS].set(
        wc_eff.astype(jnp.bfloat16))
    bc = jnp.zeros((1, NCLS_PAD), jnp.float32).at[0, :NCLS].set(bc_eff)

    # --- VMEM budget: double-buffered tiles + resident weights + slack -----
    in_itemsize = jnp.dtype(img_feat.dtype).itemsize
    tile_in = TB * D * in_itemsize
    tile_out = TB * NCLS_PAD * 4
    vmem_need = 2 * (3 * tile_in + tile_out) + (2 << 20)
    vmem_limit = int(min(max(vmem_need, 32 << 20), 64 << 20))

    row_spec = lambda i: (i, 0)            # batch-tiled arrays
    const_spec = lambda i: (0, 0)          # weights stay resident in VMEM

    out = pl.pallas_call(
        _fusion_classifier_kernel,
        out_shape=jax.ShapeDtypeStruct((B, NCLS_PAD), jnp.float32),
        grid_spec=pl.GridSpec(
            grid=(grid,),
            in_specs=[
                pl.BlockSpec((TB, D), row_spec),           # img
                pl.BlockSpec((TB, D), row_spec),           # txt
                pl.BlockSpec((TB, D), row_spec),           # aud
                pl.BlockSpec((D, OUT), const_spec),        # W_img (bf16)
                pl.BlockSpec((D, OUT), const_spec),        # W_txt (bf16)
                pl.BlockSpec((D, OUT), const_spec),        # W_aud (bf16)
                pl.BlockSpec((1, OUT), const_spec),        # fusion bias
                pl.BlockSpec((OUT, NCLS_PAD), const_spec), # classifier W' (bf16)
                pl.BlockSpec((1, NCLS_PAD), const_spec),   # classifier b'
            ],
            out_specs=pl.BlockSpec((TB, NCLS_PAD), row_spec),
        ),
        compiler_params=pltpu.CompilerParams(
            dimension_semantics=("parallel",),
            vmem_limit_bytes=vmem_limit,
        ),
    )(img_feat, txt_feat, aud_feat, w0, w1, w2, b, wc, bc)

    return out[:, :NCLS]


def init_params(key):
    """Deterministic init matching the PyTorch module's layer shapes."""
    k_w, k_b, k_wc, k_bc = jax.random.split(key, 4)
    fan_in = 3 * D
    bound = float(fan_in) ** -0.5
    # nn.Linear(384, 128): torch weight is [out, in]; we store transposed [in, out]
    w = jax.random.uniform(k_w, (fan_in, OUT), jnp.float32, -bound, bound)
    b = jax.random.uniform(k_b, (OUT,), jnp.float32, -bound, bound)
    gamma = jnp.ones((OUT,), jnp.float32)   # nn.LayerNorm(128) defaults
    beta = jnp.zeros((OUT,), jnp.float32)
    cb = float(OUT) ** -0.5
    wc = jax.random.uniform(k_wc, (OUT, NCLS), jnp.float32, -cb, cb)  # nn.Linear(128, 5)
    bc = jax.random.uniform(k_bc, (NCLS,), jnp.float32, -cb, cb)
    return {
        "w_img": w[0 * D:1 * D].astype(jnp.bfloat16),   # pre-cast once: bf16 MXU path
        "w_txt": w[1 * D:2 * D].astype(jnp.bfloat16),
        "w_aud": w[2 * D:3 * D].astype(jnp.bfloat16),
        "b": b, "gamma": gamma, "beta": beta,
        "wc": wc, "bc": bc,
    }


def reference(img, txt, aud, p):
    """Pure-JAX reference with matching bf16-matmul numerics.
    (Deviates from pure-f32 PyTorch by O(1e-3) due to bf16 MXU operands.)"""
    h = (jnp.dot(img.astype(jnp.bfloat16), p["w_img"], preferred_element_type=jnp.float32)
         + jnp.dot(txt.astype(jnp.bfloat16), p["w_txt"], preferred_element_type=jnp.float32)
         + jnp.dot(aud.astype(jnp.bfloat16), p["w_aud"], preferred_element_type=jnp.float32)
         + p["b"])
    h = jnp.maximum(h, 0.0)
    mean = h.mean(-1, keepdims=True)
    var = ((h - mean) ** 2).mean(-1, keepdims=True)
    normed = (h - mean) * jax.lax.rsqrt(var + EPS)
    fused = normed * p["gamma"] + p["beta"]
    return jnp.dot(fused.astype(jnp.bfloat16), p["wc"].astype(jnp.bfloat16),
                   preferred_element_type=jnp.float32) + p["bc"]


if __name__ == "__main__":
    key = jax.random.PRNGKey(0)
    k_params, k_img, k_txt, k_aud = jax.random.split(key, 4)
    params = init_params(k_params)

    # Case 1: tiny batch -> single full-array tile.
    B1 = 12
    img1 = jax.random.normal(k_img, (B1, D), jnp.float32)
    txt1 = jax.random.normal(k_txt, (B1, D), jnp.float32)
    aud1 = jax.random.normal(k_aud, (B1, D), jnp.float32)
    logits1 = jax.block_until_ready(multimodal_forward(img1, txt1, aud1, params))
    ref1 = reference(img1, txt1, aud1, params)
    assert logits1.shape == (B1, NCLS)
    err1 = float(jnp.max(jnp.abs(logits1 - ref1)))
    assert bool(jnp.allclose(logits1, ref1, atol=2e-3, rtol=2e-3)), err1

    # Case 2: batch that exercises a >=2-step "parallel" grid plus a partial
    # (masked) edge tile, with no wrapper-side padding of the inputs.
    B2 = 300
    img2 = jax.random.normal(jax.random.fold_in(k_img, 1), (B2, D), jnp.float32)
    txt2 = jax.random.normal(jax.random.fold_in(k_txt, 1), (B2, D), jnp.float32)
    aud2 = jax.random.normal(jax.random.fold_in(k_aud, 1), (B2, D), jnp.float32)
    logits2 = jax.block_until_ready(multimodal_forward(img2, txt2, aud2, params))
    ref2 = reference(img2, txt2, aud2, params)
    assert logits2.shape == (B2, NCLS)
    err2 = float(jnp.max(jnp.abs(logits2 - ref2)))
    assert bool(jnp.allclose(logits2, ref2, atol=2e-3, rtol=2e-3)), err2

    print("KERNEL_OK")
</pallas_src>

<mosaic_0001>
module attributes {stable_mosaic.version = 11 : i64} {
  func.func @_fusion_classifier_kernel(%arg0: i32, %arg1: memref<12x128xf32, #tpu.memory_space<vmem>>, %arg2: memref<12x128xf32, #tpu.memory_space<vmem>>, %arg3: memref<12x128xf32, #tpu.memory_space<vmem>>, %arg4: memref<128x128xbf16, #tpu.memory_space<vmem>>, %arg5: memref<128x128xbf16, #tpu.memory_space<vmem>>, %arg6: memref<128x128xbf16, #tpu.memory_space<vmem>>, %arg7: memref<1x128xf32, #tpu.memory_space<vmem>>, %arg8: memref<128x8xbf16, #tpu.memory_space<vmem>>, %arg9: memref<1x8xf32, #tpu.memory_space<vmem>>, %arg10: memref<12x8xf32, #tpu.memory_space<vmem>>) attributes {dimension_semantics = [#tpu.dimension_semantics<parallel>], iteration_bounds = array<i64: 1>, scalar_prefetch = 0 : i64, scratch_operands = 0 : i64, tpu.core_type = #tpu.core_type<tc>, window_params = [{transform_indices = @transform_0, window_bounds = array<i64: 12, 128>}, {transform_indices = @transform_1, window_bounds = array<i64: 12, 128>}, {transform_indices = @transform_2, window_bounds = array<i64: 12, 128>}, {pipeline_mode = #tpu.pipeline_mode<synchronous>, transform_indices = @transform_3, window_bounds = array<i64: 128, 128>}, {pipeline_mode = #tpu.pipeline_mode<synchronous>, transform_indices = @transform_4, window_bounds = array<i64: 128, 128>}, {pipeline_mode = #tpu.pipeline_mode<synchronous>, transform_indices = @transform_5, window_bounds = array<i64: 128, 128>}, {pipeline_mode = #tpu.pipeline_mode<synchronous>, transform_indices = @transform_6, window_bounds = array<i64: 1, 128>}, {pipeline_mode = #tpu.pipeline_mode<synchronous>, transform_indices = @transform_7, window_bounds = array<i64: 128, 8>}, {pipeline_mode = #tpu.pipeline_mode<synchronous>, transform_indices = @transform_8, window_bounds = array<i64: 1, 8>}, {transform_indices = @transform_9, window_bounds = array<i64: 12, 8>}]} {
    %c0 = arith.constant 0 : index
    %c0_0 = arith.constant 0 : index
    %0 = vector.load %arg1[%c0, %c0_0] : memref<12x128xf32, #tpu.memory_space<vmem>>, vector<12x128xf32>
    %1 = arith.truncf %0 : vector<12x128xf32> to vector<12x128xbf16>
    %c0_1 = arith.constant 0 : index
    %c0_2 = arith.constant 0 : index
    %2 = vector.load %arg4[%c0_1, %c0_2] : memref<128x128xbf16, #tpu.memory_space<vmem>>, vector<128x128xbf16>
    %cst = arith.constant dense<0.000000e+00> : vector<12x128xf32>
    %3 = tpu.matmul %1, %2, %cst {dimension_numbers = #tpu.dot_dimension_numbers<[1], [0], [0], [1], [0, 0, 1, 1], [], []>} : vector<12x128xbf16>, vector<128x128xbf16>, vector<12x128xf32> -> vector<12x128xf32>
    %c0_3 = arith.constant 0 : index
    %c0_4 = arith.constant 0 : index
    %4 = vector.load %arg2[%c0_3, %c0_4] : memref<12x128xf32, #tpu.memory_space<vmem>>, vector<12x128xf32>
    %5 = arith.truncf %4 : vector<12x128xf32> to vector<12x128xbf16>
    %c0_5 = arith.constant 0 : index
    %c0_6 = arith.constant 0 : index
    %6 = vector.load %arg5[%c0_5, %c0_6] : memref<128x128xbf16, #tpu.memory_space<vmem>>, vector<128x128xbf16>
    %cst_7 = arith.constant dense<0.000000e+00> : vector<12x128xf32>
    %7 = tpu.matmul %5, %6, %cst_7 {dimension_numbers = #tpu.dot_dimension_numbers<[1], [0], [0], [1], [0, 0, 1, 1], [], []>} : vector<12x128xbf16>, vector<128x128xbf16>, vector<12x128xf32> -> vector<12x128xf32>
    %8 = arith.addf %3, %7 : vector<12x128xf32>
    %c0_8 = arith.constant 0 : index
    %c0_9 = arith.constant 0 : index
    %9 = vector.load %arg3[%c0_8, %c0_9] : memref<12x128xf32, #tpu.memory_space<vmem>>, vector<12x128xf32>
    %10 = arith.truncf %9 : vector<12x128xf32> to vector<12x128xbf16>
    %c0_10 = arith.constant 0 : index
    %c0_11 = arith.constant 0 : index
    %11 = vector.load %arg6[%c0_10, %c0_11] : memref<128x128xbf16, #tpu.memory_space<vmem>>, vector<128x128xbf16>
    %cst_12 = arith.constant dense<0.000000e+00> : vector<12x128xf32>
    %12 = tpu.matmul %10, %11, %cst_12 {dimension_numbers = #tpu.dot_dimension_numbers<[1], [0], [0], [1], [0, 0, 1, 1], [], []>} : vector<12x128xbf16>, vector<128x128xbf16>, vector<12x128xf32> -> vector<12x128xf32>
    %13 = arith.addf %8, %12 : vector<12x128xf32>
    %c0_13 = arith.constant 0 : index
    %c0_14 = arith.constant 0 : index
    %14 = vector.load %arg7[%c0_13, %c0_14] : memref<1x128xf32, #tpu.memory_space<vmem>>, vector<1x128xf32>
    %15 = vector.broadcast %14 : vector<1x128xf32> to vector<12x128xf32>
    %16 = arith.addf %13, %15 : vector<12x128xf32>
    %cst_15 = arith.constant 0.000000e+00 : f32
    %17 = vector.broadcast %cst_15 : f32 to vector<12x128xf32>
    %18 = arith.maximumf %16, %17 : vector<12x128xf32>
    %cst_16 = arith.constant dense<0.000000e+00> : vector<12xf32>
    %19 = vector.multi_reduction <add>, %18, %cst_16 [1] : vector<12x128xf32> to vector<12xf32>
    %20 = vector.shape_cast %19 : vector<12xf32> to vector<12x1xf32>
    %cst_17 = arith.constant 1.280000e+02 : f32
    %21 = vector.broadcast %cst_17 : f32 to vector<12x1xf32>
    %22 = arith.divf %20, %21 : vector<12x1xf32>
    %23 = vector.broadcast %22 : vector<12x1xf32> to vector<12x128xf32>
    %24 = arith.subf %18, %23 : vector<12x128xf32>
    %25 = arith.mulf %24, %24 : vector<12x128xf32>
    %cst_18 = arith.constant dense<0.000000e+00> : vector<12xf32>
    %26 = vector.multi_reduction <add>, %25, %cst_18 [1] : vector<12x128xf32> to vector<12xf32>
    %27 = vector.shape_cast %26 : vector<12xf32> to vector<12x1xf32>
    %cst_19 = arith.constant 1.280000e+02 : f32
    %28 = vector.broadcast %cst_19 : f32 to vector<12x1xf32>
    %29 = arith.divf %27, %28 : vector<12x1xf32>
    %cst_20 = arith.constant 9.99999974E-6 : f32
    %30 = vector.broadcast %cst_20 : f32 to vector<12x1xf32>
    %31 = arith.addf %29, %30 : vector<12x1xf32>
    %32 = math.rsqrt %31 : vector<12x1xf32>
    %33 = vector.broadcast %32 : vector<12x1xf32> to vector<12x128xf32>
    %34 = arith.mulf %24, %33 : vector<12x128xf32>
    %35 = arith.truncf %34 : vector<12x128xf32> to vector<12x128xbf16>
    %c0_21 = arith.constant 0 : index
    %c0_22 = arith.constant 0 : index
    %36 = vector.load %arg8[%c0_21, %c0_22] : memref<128x8xbf16, #tpu.memory_space<vmem>>, vector<128x8xbf16>
    %cst_23 = arith.constant dense<0.000000e+00> : vector<12x8xf32>
    %37 = tpu.matmul %35, %36, %cst_23 {dimension_numbers = #tpu.dot_dimension_numbers<[1], [0], [0], [1], [0, 0, 1, 1], [], []>} : vector<12x128xbf16>, vector<128x8xbf16>, vector<12x8xf32> -> vector<12x8xf32>
    %c0_24 = arith.constant 0 : index
    %c0_25 = arith.constant 0 : index
    %38 = vector.load %arg9[%c0_24, %c0_25] : memref<1x8xf32, #tpu.memory_space<vmem>>, vector<1x8xf32>
    %39 = vector.broadcast %38 : vector<1x8xf32> to vector<12x8xf32>
    %40 = arith.addf %37, %39 : vector<12x8xf32>
    %c0_26 = arith.constant 0 : index
    %c0_27 = arith.constant 0 : index
    %41 = vector.load %arg10[%c0_26, %c0_27] : memref<12x8xf32, #tpu.memory_space<vmem>>, vector<12x8xf32>
    tpu.vector_store %arg10[%c0_26, %c0_27], %40 {strides = array<i32>} : memref<12x8xf32, #tpu.memory_space<vmem>>, vector<12x8xf32>,
    return
  }
  func.func @transform_0(%arg0: i32) -> (i32, i32) {
    %c0_i32 = arith.constant 0 : i32
    %c0_i32_0 = arith.constant 0 : i32
    return %arg0, %c0_i32 : i32, i32
  }
  func.func @transform_1(%arg0: i32) -> (i32, i32) {
    %c0_i32 = arith.constant 0 : i32
    %c0_i32_0 = arith.constant 0 : i32
    return %arg0, %c0_i32 : i32, i32
  }
  func.func @transform_2(%arg0: i32) -> (i32, i32) {
    %c0_i32 = arith.constant 0 : i32
    %c0_i32_0 = arith.constant 0 : i32
    return %arg0, %c0_i32 : i32, i32
  }
  func.func @transform_3(%arg0: i32) -> (i32, i32) {
    %c0_i32 = arith.constant 0 : i32
    %c0_i32_0 = arith.constant 0 : i32
    %c0_i32_1 = arith.constant 0 : i32
    return %c0_i32, %c0_i32_0 : i32, i32
  }
  func.func @transform_4(%arg0: i32) -> (i32, i32) {
    %c0_i32 = arith.constant 0 : i32
    %c0_i32_0 = arith.constant 0 : i32
    %c0_i32_1 = arith.constant 0 : i32
    return %c0_i32, %c0_i32_0 : i32, i32
  }
  func.func @transform_5(%arg0: i32) -> (i32, i32) {
    %c0_i32 = arith.constant 0 : i32
    %c0_i32_0 = arith.constant 0 : i32
    %c0_i32_1 = arith.constant 0 : i32
    return %c0_i32, %c0_i32_0 : i32, i32
  }
  func.func @transform_6(%arg0: i32) -> (i32, i32) {
    %c0_i32 = arith.constant 0 : i32
    %c0_i32_0 = arith.constant 0 : i32
    %c0_i32_1 = arith.constant 0 : i32
    return %c0_i32, %c0_i32_0 : i32, i32
  }
  func.func @transform_7(%arg0: i32) -> (i32, i32) {
    %c0_i32 = arith.constant 0 : i32
    %c0_i32_0 = arith.constant 0 : i32
    %c0_i32_1 = arith.constant 0 : i32
    return %c0_i32, %c0_i32_0 : i32, i32
  }
  func.func @transform_8(%arg0: i32) -> (i32, i32) {
    %c0_i32 = arith.constant 0 : i32
    %c0_i32_0 = arith.constant 0 : i32
    %c0_i32_1 = arith.constant 0 : i32
    return %c0_i32, %c0_i32_0 : i32, i32
  }
  func.func @transform_9(%arg0: i32) -> (i32, i32) {
    %c0_i32 = arith.constant 0 : i32
    %c0_i32_0 = arith.constant 0 : i32
    return %arg0, %c0_i32 : i32, i32
  }
}

</mosaic_0001>

<bundles_post_ra>
// kernel: multimodal_forward.1
= control target key start
LH: loop header
LB: loop body
LE: loop exit
PB: predicated region body
PF: predicated region fallthrough
CT: control target
= control target key end

     0   :  { %v705_v0 = vmov 0.0   ;;  %vm706_vm0 = vmmov 0   ;;  %vm372_vm1 = vcmask 1043456   ;;  %vm509_vm2 = vcmask 64512   ;;  %s925_s4 = inlined_call_operand.vmem [shape: bf16[128,128], index: 4, kind: input, shape index: {}]   ;;  %s926_s3 = inlined_call_operand.vmem [shape: bf16[128,128], index: 3, kind: input, shape index: {}]   ;;  %s927_s5 = inlined_call_operand.vmem [shape: bf16[128,128], index: 5, kind: input, shape index: {}]   ;;  %s928_s1 = inlined_call_operand.vmem [shape: f32[12,128], index: 1, kind: input, shape index: {}]   ;;  %s929_s0 = inlined_call_operand.vmem [shape: f32[12,128], index: 0, kind: input, shape index: {}]   ;;  %s930_s2 = inlined_call_operand.vmem [shape: f32[12,128], index: 2, kind: input, shape index: {}]   ;;  %s931_s6 = inlined_call_operand.vmem [shape: f32[1,128], index: 6, kind: input, shape index: {}]   ;;  %s932_s7 = inlined_call_operand.vmem [shape: bf16[128,8], index: 7, kind: input, shape index: {}]   ;;  %s933_s8 = inlined_call_operand.vmem [shape: f32[1,8], index: 8, kind: input, shape index: {}]   ;;  %s934_s9 = inlined_call_operand.vmem [shape: f32[12,8], index: 9, kind: output, shape index: {}]  }
   0x1   :  { %587 = vmatprep.subr.bf16.mxu0 %v705_v0  ;;  %607 = vmatprep.subr.bf16.mxu1 %v705_v0  ;;  %v669_v1 = vld [vmem:[%s925_s4 + $0x38] sm:$0xff]   ;;  %v671_v3 = vld [vmem:[%s925_s4 + $0x30] sm:$0xff]   ;;  %v673_v5 = vld [vmem:[%s925_s4 + $0x28] sm:$0xff]   ;;  %vm511_vm3 = vcmask 60416  }
   0x2   :  { %v670_v2 = vld [vmem:[%s926_s3 + $0x38] sm:$0xff]   ;;  %603 = vmatprep.mubr.msk.bf16.mxu0 %vm706_vm0, %v705_v0  ;;  %623 = vmatprep.mubr.msk.bf16.mxu1 %vm706_vm0, %v705_v0  ;;  %v672_v4 = vld [vmem:[%s926_s3 + $0x30] sm:$0xff]   ;;  %v674_v6 = vld [vmem:[%s926_s3 + $0x28] sm:$0xff]  }
   0x3   :  { %588 = vmatpush3.bf16.msra.mxu0 %v669_v1  ;;  %608 = vmatpush3.bf16.msra.mxu1 %v670_v2  ;;  %v675_v7 = vld [vmem:[%s925_s4 + $0x20] sm:$0xff]   ;;  %v677_v9 = vld [vmem:[%s925_s4 + $0x18] sm:$0xff]   ;;  %v679_v11 = vld [vmem:[%s925_s4 + $0x10] sm:$0xff]  }
   0x4   :  { %589 = vmatprep.subr.bf16.mxu0 %v705_v0  ;;  %609 = vmatprep.subr.bf16.mxu1 %v705_v0  ;;  %v676_v8 = vld [vmem:[%s926_s3 + $0x20] sm:$0xff]   ;;  %v678_v10 = vld [vmem:[%s926_s3 + $0x18] sm:$0xff]   ;;  %v680_v12 = vld [vmem:[%s926_s3 + $0x10] sm:$0xff]  }
   0x5   :  { %v681_v13 = vld [vmem:[%s925_s4 + $0x8] sm:$0xff]   ;;  %v683_v15 = vld [vmem:[%s925_s4] sm:$0xff]   ;;  %v685_v23 = vld [vmem:[%s927_s5 + $0x38] sm:$0xff]  }
   0x6   :  { %v682_v14 = vld [vmem:[%s926_s3 + $0x8] sm:$0xff]   ;;  %v52_v16 = vld [vmem:[%s928_s1] sm:$0xff]  ;;  %v686_v24 = vld [vmem:[%s927_s5 + $0x30] sm:$0xff]  }
   0x7   :  { %590 = vmatpush3.bf16.msra.mxu0 %v671_v3  ;;  %610 = vmatpush3.bf16.msra.mxu1 %v672_v4  ;;  %v53_v17 = vld [vmem:[%s928_s1 + $0x8] sm:$0xf]  ;;  %v684_v18 = vld [vmem:[%s926_s3] sm:$0xff]   ;;  %v689_v27 = vld [vmem:[%s927_s5 + $0x18] sm:$0xff]  }
   0x8   :  { %591 = vmatprep.subr.bf16.mxu0 %v705_v0  ;;  %611 = vmatprep.subr.bf16.mxu1 %v705_v0  ;;  %v33_v19 = vld [vmem:[%s929_s0] sm:$0xff]  ;;  %v34_v20 = vld [vmem:[%s929_s0 + $0x8] sm:$0xf]  ;;  %v54_v21 = vpack.c.bf16 %v53_v17, %v52_v16  ;;  %v690_v28 = vld [vmem:[%s927_s5 + $0x10] sm:$0xff]  }
   0x9   :  { %v35_v22 = vpack.c.bf16 %v34_v20, %v33_v19  ;;  %v687_v25 = vld [vmem:[%s927_s5 + $0x28] sm:$0xff]   ;;  %v688_v26 = vld [vmem:[%s927_s5 + $0x20] sm:$0xff]   ;;  %v693_v56 = vld [vmem:[%s932_s7 + $0x38] sm:$0xff]  }
   0xa   :  { %v691_v29 = vld [vmem:[%s927_s5 + $0x8] sm:$0xff]   ;;  %v692_v30 = vld [vmem:[%s927_s5] sm:$0xff]   ;;  %v694_v57 = vld [vmem:[%s932_s7 + $0x30] sm:$0xff]  }
   0xb   :  { %592 = vmatpush3.bf16.msra.mxu0 %v673_v5  ;;  %612 = vmatpush3.bf16.msra.mxu1 %v674_v6  ;;  %v249_v31 = vld [vmem:[%s930_s2] sm:$0xff]  ;;  %v250_v32 = vld [vmem:[%s930_s2 + $0x8] sm:$0xf]  ;;  %v697_v6 = vld [vmem:[%s932_s7 + $0x18] sm:$0xff]  }
   0xc   :  { %593 = vmatprep.subr.bf16.mxu0 %v705_v0  ;;  %613 = vmatprep.subr.bf16.mxu1 %v705_v0  ;;  %v251_v33 = vpack.c.bf16 %v250_v32, %v249_v31  ;;  %v541_v50 = vld [vmem:[%s931_s6] ss:$0 sm:$0xff]  ;;  %v695_v4 = vld [vmem:[%s932_s7 + $0x28] sm:$0xff]  }
   0xd   :  { %v696_v5 = vld [vmem:[%s932_s7 + $0x20] sm:$0xff]  }
   0xf   :  { %594 = vmatpush3.bf16.msra.mxu0 %v675_v7  ;;  %614 = vmatpush3.bf16.msra.mxu1 %v676_v8  ;;  %v698_v7 = vld [vmem:[%s932_s7 + $0x10] sm:$0xff]   ;;  %v699_v8 = vld [vmem:[%s932_s7 + $0x8] sm:$0xff]  }
  0x10   :  { %595 = vmatprep.subr.bf16.mxu0 %v705_v0  ;;  %615 = vmatprep.subr.bf16.mxu1 %v705_v0 }
  0x13   :  { %596 = vmatpush3.bf16.msra.mxu0 %v677_v9  ;;  %616 = vmatpush3.bf16.msra.mxu1 %v678_v10  ;;  %v700_v9 = vld [vmem:[%s932_s7] sm:$0xff]  }
  0x14   :  { %597 = vmatprep.subr.bf16.mxu0 %v705_v0  ;;  %617 = vmatprep.subr.bf16.mxu1 %v705_v0 }
  0x17   :  { %598 = vmatpush3.bf16.msra.mxu0 %v679_v11  ;;  %618 = vmatpush3.bf16.msra.mxu1 %v680_v12 }
  0x18   :  { %599 = vmatprep.subr.bf16.mxu0 %v705_v0  ;;  %619 = vmatprep.subr.bf16.mxu1 %v705_v0 }
  0x1b   :  { %600 = vmatpush3.bf16.msra.mxu0 %v681_v13  ;;  %620 = vmatpush3.bf16.msra.mxu1 %v682_v14 }
  0x1c   :  { %601 = vmatprep.subr.bf16.mxu0 %v705_v0  ;;  %621 = vmatprep.subr.bf16.mxu1 %v705_v0 }
  0x1f   :  { %602 = vmatpush3.bf16.msra.mxu0 %v683_v15  ;;  %622 = vmatpush3.bf16.msra.mxu1 %v684_v18 }
  0x20   :  { %627 = vmatprep.subr.bf16.mxu0 %v705_v0  ;;  %647 = vmatprep.subr.bf16.mxu1 %v705_v0 }
  0x22   :  { %604 = vmatmul.mubr.bf16.vlgmr.msra.gmra.mxu0 %v54_v21  ;;  %624 = vmatmul.mubr.bf16.vlgmr.msra.gmra.mxu1 %v35_v22  ;;  %v542_v21 = vld [vmem:[%s933_s8] ss:$0 sm:$0xff] }
  0x23   :  { %628 = vmatpush3.bf16.msra.mxu0 %v685_v23  ;;  %643 = vmatprep.mubr.msk.bf16.mxu0 %vm706_vm0, %v705_v0 }
  0x24   :  { %629 = vmatprep.subr.bf16.mxu0 %v705_v0  ;;  %663 = vmatprep.mubr.msk.bf16.mxu1 %vm706_vm0, %v705_v0 }
  0x25   :  { %648 = vmatpush3.bf16.msra.mxu1 %v693_v56 }
  0x26   :  { %649 = vmatprep.subr.bf16.mxu1 %v705_v0 }
  0x27   :  { %630 = vmatpush3.bf16.msra.mxu0 %v686_v24 }
  0x28   :  { %631 = vmatprep.subr.bf16.mxu0 %v705_v0 }
  0x29   :  { %650 = vmatpush3.bf16.msra.mxu1 %v694_v57 }
  0x2a   :  { %651 = vmatprep.subr.bf16.mxu1 %v705_v0 }
  0x2b   :  { %632 = vmatpush3.bf16.msra.mxu0 %v687_v25 }
  0x2c   :  { %633 = vmatprep.subr.bf16.mxu0 %v705_v0 }
  0x2d   :  { %652 = vmatpush3.bf16.msra.mxu1 %v695_v4 }
  0x2e   :  { %653 = vmatprep.subr.bf16.mxu1 %v705_v0 }
  0x2f   :  { %634 = vmatpush3.bf16.msra.mxu0 %v688_v26 }
  0x30   :  { %635 = vmatprep.subr.bf16.mxu0 %v705_v0 }
  0x31   :  { %654 = vmatpush3.bf16.msra.mxu1 %v696_v5 }
  0x32   :  { %655 = vmatprep.subr.bf16.mxu1 %v705_v0 }
  0x33   :  { %636 = vmatpush3.bf16.msra.mxu0 %v689_v27 }
  0x34   :  { %637 = vmatprep.subr.bf16.mxu0 %v705_v0 }
  0x35   :  { %656 = vmatpush3.bf16.msra.mxu1 %v697_v6 }
  0x36   :  { %657 = vmatprep.subr.bf16.mxu1 %v705_v0 }
  0x37   :  { %638 = vmatpush3.bf16.msra.mxu0 %v690_v28 }
  0x38   :  { %639 = vmatprep.subr.bf16.mxu0 %v705_v0 }
  0x39   :  { %658 = vmatpush3.bf16.msra.mxu1 %v698_v7 }
  0x3a   :  { %659 = vmatprep.subr.bf16.mxu1 %v705_v0 }
  0x3b   :  { %640 = vmatpush3.bf16.msra.mxu0 %v691_v29 }
  0x3c   :  { %641 = vmatprep.subr.bf16.mxu0 %v705_v0 }
  0x3d   :  { %660 = vmatpush3.bf16.msra.mxu1 %v699_v8 }
  0x3e   :  { %661 = vmatprep.subr.bf16.mxu1 %v705_v0 }
  0x3f   :  { %642 = vmatpush3.bf16.msra.mxu0 %v692_v30 }
  0x41   :  { %662 = vmatpush3.bf16.msra.mxu1 %v700_v9 }
  0x42   :  { %644 = vmatmul.mubr.bf16.vlgmr.msra.gmra.mxu0 %v251_v33 }
  0xe2   :  { %v153_v34 = vpop.f32.mrf.mxu0  ;;  %v242_v35 = vpop.f32.mrf.mxu1 }
  0xe3   :  { %v243_v45 = vadd.f32 %v242_v35, %v153_v34 }
  0xe4   :  { %v605_v36 = vpop.f32.mrf.mxu0  ;;  %v625_v37 = vpop.f32.mrf.mxu1 }
  0xe6   :  { %v156_v38 = vpop.f32.mrf.mxu0  ;;  %v245_v39 = vpop.f32.mrf.mxu1 }
  0xe7   :  { %v246_v44 = vadd.f32 %v245_v39, %v156_v38 }
  0xe8   :  { %v606_v40 = vpop.f32.mrf.mxu0  ;;  %v626_v41 = vpop.f32.mrf.mxu1 }
 0x102   :  { %v350_v42 = vpop.f32.mrf.mxu0 }
 0x103   :  { %v357_v48 = vadd.f32 %v350_v42, %v243_v45 }
 0x104   :  { %v645_v43 = vpop.f32.mrf.mxu0 }
 0x105   :  { %v366_v53 = vadd.f32 %v541_v50, %v357_v48 }
 0x106   :  { %v353_v46 = vpop.f32.mrf.mxu0 }
 0x107   :  { %v358_v47 = vadd.f32 %v353_v46, %v246_v44  ;;  %v368_v55 = vmax.f32 %v366_v53, 0.0 }
 0x108   :  { %v646_v49 = vpop.f32.mrf.mxu0 }
 0x109   :  { %v367_v51 = vadd.f32 %v541_v50, %v358_v47 }
 0x10b   :  { %v369_v52 = vmax.f32 %v367_v51, 0.0 }
 0x10d   :  { %v373_v54 = vsel %vm372_vm1, %v369_v52, 0.0 }
 0x10e   :  { %374 = vadd.xlane.f32.xlu0 %v373_v54 }
 0x112   :  { %370 = vadd.xlane.f32.xlu0 %v368_v55 }
 0x197   :  { %v375_v58 = vpop.xlane.xlu0 %374 }
 0x198   :  { %v378_v59 = vmul.f32 0.0078125, %v375_v58 }
 0x19a   :  { %v380_v62 = vsub.f32 %v369_v52, %v378_v59 }
 0x19b   :  { %v371_v60 = vpop.xlane.xlu0 %370 }
 0x19c   :  { %v377_v61 = vmul.f32 0.0078125, %v371_v60  ;;  %v382_v2 = vmul.f32 %v380_v62, %v380_v62 }
 0x19e   :  { %v379_v63 = vsub.f32 %v368_v55, %v377_v61  ;;  %v385_v3 = vsel %vm372_vm1, %v382_v2, 0.0 }
 0x1a0   :  { %v381_v1 = vmul.f32 %v379_v63, %v379_v63 }
 0x1a2   :  { %383 = vadd.xlane.f32.xlu1 %v381_v1 }
 0x1a6   :  { %386 = vadd.xlane.f32.xlu1 %v385_v3 }
 0x22b   :  { %v384_v10 = vpop.xlane.xlu1 %383 }
 0x22c   :  { %v388_v11 = vmul.f32 0.0078125, %v384_v10 }
 0x22e   :  { %v390_v12 = vadd.f32 1e-05, %v388_v11 }
 0x22f   :  { %v387_v13 = vpop.xlane.xlu1 %386 }
 0x230   :  { %v389_v14 = vmul.f32 0.0078125, %v387_v13  ;;  %701 = vrsqrt.f32 %v390_v12 }
 0x232   :  { %v391_v15 = vadd.f32 1e-05, %v389_v14 }
 0x234   :  { %703 = vrsqrt.f32 %v391_v15 }
 0x23d   :  { %v702_v16 = vpop.eup %701 }
 0x23e   :  { %v394_v18 = vmul.f32 %v702_v16, %v379_v63 }
 0x241   :  { %v704_v17 = vpop.eup %703 }
 0x242   :  { %v395_v19 = vmul.f32 %v704_v17, %v380_v62 }
 0x244   :  { %v396_v20 = vpack.c.bf16 %v395_v19, %v394_v18 }
 0x246   :  { %664 = vmatmul.mubr.bf16.vlgmr.msra.gmra.mxu1 %v396_v20 }
 0x306   :  { %v502_v0 = vpop.f32.mrf.mxu1 }
 0x307   :  { %v503_v22 = vadd.f32 %v542_v21, %v502_v0 }
 0x308   :  { %v665_v23 = vpop.f32.mrf.mxu1 }
 0x309   :  { %510 = vst.msk [vmem:[%s934_s9] sm:$0xff] %vm509_vm2, %v503_v22 }
 0x30a   :  { %v505_v24 = vpop.f32.mrf.mxu1 }
 0x30b   :  { %v506_v25 = vadd.f32 %v542_v21, %v505_v24 }
 0x30c   :  { %v666_v26 = vpop.f32.mrf.mxu1 }
 0x30d   :  { %512 = vst.msk [vmem:[%s934_s9 + $0x8] sm:$0xf] %vm511_vm3, %v506_v25 }

</bundles_post_ra>
